<compile_context>
chip_gen: v5e
topology: v5e:2x2
jax: 0.10.0
libtpu: 0.0.40
codegen_flags: <defaults>
</compile_context>

<pallas_src>
import functools

import jax
import jax.numpy as jnp
from jax.experimental import pallas as pl
from jax.experimental.pallas import tpu as pltpu


def _adaptive_threshold_kernel(x_ref, o_ref, *, mean_scalar, inv_m):
    # x_ref/o_ref: (r_blk, M) — each row is one (image, channel) spatial map,
    # M = H*W on the lane axis (lane-dense when M % 128 == 0).
    x = x_ref[...]
    xf = x.astype(jnp.float32)
    mean = jnp.sum(xf, axis=-1, keepdims=True) * inv_m        # (r_blk, 1)
    thr = mean * mean_scalar
    mask = (xf > thr).astype(x.dtype)
    # Matches torch: x * (x > threshold)  (preserves NaN/Inf propagation).
    o_ref[...] = (x * mask).astype(o_ref.dtype)


def _pick_row_block(R, M, itemsize, target_bytes=2 << 20, min_steps=4):
    """Row tile for the (R, M) view.

    - multiple of the packed-sublane granularity (8 f32 / 16 bf16 / 32 int8),
      or the full extent R (always legal),
    - one block <= ~target_bytes so double-buffered in+out (4 * block) fits
      every generation's default scoped VMEM,
    - capped near R/min_steps so the parallel grid keeps both v7x cores busy.
    A non-dividing tile is fine: rows are independent and the partial last
    block's out-of-bounds region is not written back.
    """
    sub = {4: 8, 2: 16, 1: 32}.get(itemsize, 8)
    row_bytes = itemsize * M
    max_rows = max(sub, (target_bytes // max(row_bytes, 1)) // sub * sub)
    if R >= min_steps * sub:
        cap = max(sub, (pl.cdiv(R, min_steps) // sub) * sub)
        max_rows = min(max_rows, cap)
    if R <= max_rows:
        return R          # single full-extent block (legal for any R)
    return max_rows       # cdiv grid; partial last block is safe


def adaptive_threshold_forward(x, *, mean_scalar=1.0):
    """x: (N, C, H, W) -> x * (x > x.mean(dim=(2,3), keepdim=True) * mean_scalar)."""
    N, C, H, W = x.shape
    M = H * W
    R = N * C

    # Free reshape (row-major contiguous): (N, C, H, W) -> (N*C, H*W).
    x_flat = x.reshape(R, M)

    r_blk = _pick_row_block(R, M, x.dtype.itemsize)
    grid = (pl.cdiv(R, r_blk),)

    out = pl.pallas_call(
        functools.partial(
            _adaptive_threshold_kernel,
            mean_scalar=float(mean_scalar),
            inv_m=1.0 / float(M),
        ),
        out_shape=jax.ShapeDtypeStruct((R, M), x.dtype),
        grid=grid,
        in_specs=[pl.BlockSpec((r_blk, M), lambda i: (i, 0))],
        out_specs=pl.BlockSpec((r_blk, M), lambda i: (i, 0)),
        compiler_params=pltpu.CompilerParams(
            dimension_semantics=("parallel",)),  # rows fully independent
    )(x_flat)

    return out.reshape(N, C, H, W)


if __name__ == "__main__":
    key = jax.random.PRNGKey(0)
    N, C, H, W = 2, 4, 16, 16
    x = jax.random.normal(key, (N, C, H, W), dtype=jnp.float32)

    mean_scalar = 1.0
    fwd = jax.jit(functools.partial(adaptive_threshold_forward,
                                    mean_scalar=mean_scalar))
    out = fwd(x)
    out = jax.block_until_ready(out)

    # Reference check (same formula as the PyTorch module).
    means = jnp.mean(x, axis=(2, 3), keepdims=True)
    ref = x * (x > means * mean_scalar)
    assert out.shape == (N, C, H, W)
    assert bool(jnp.all(jnp.isfinite(out)))
    assert bool(jnp.allclose(out, ref, atol=1e-6, rtol=1e-6))
    print("KERNEL_OK")
</pallas_src>

<mosaic_0001>
module attributes {stable_mosaic.version = 11 : i64} {
  func.func @_adaptive_threshold_kernel(%arg0: i32, %arg1: memref<8x256xf32, #tpu.memory_space<vmem>>, %arg2: memref<8x256xf32, #tpu.memory_space<vmem>>) attributes {dimension_semantics = [#tpu.dimension_semantics<parallel>], iteration_bounds = array<i64: 1>, scalar_prefetch = 0 : i64, scratch_operands = 0 : i64, tpu.core_type = #tpu.core_type<tc>, window_params = [{transform_indices = @transform_0, window_bounds = array<i64: 8, 256>}, {transform_indices = @transform_1, window_bounds = array<i64: 8, 256>}]} {
    %c0 = arith.constant 0 : index
    %c0_0 = arith.constant 0 : index
    %0 = vector.load %arg1[%c0, %c0_0] : memref<8x256xf32, #tpu.memory_space<vmem>>, vector<8x256xf32>
    %cst = arith.constant dense<0.000000e+00> : vector<8xf32>
    %1 = vector.multi_reduction <add>, %0, %cst [1] : vector<8x256xf32> to vector<8xf32>
    %2 = vector.shape_cast %1 : vector<8xf32> to vector<8x1xf32>
    %cst_1 = arith.constant 3.906250e-03 : f32
    %3 = vector.broadcast %cst_1 : f32 to vector<8x1xf32>
    %4 = arith.mulf %2, %3 : vector<8x1xf32>
    %cst_2 = arith.constant 1.000000e+00 : f32
    %5 = vector.broadcast %cst_2 : f32 to vector<8x1xf32>
    %6 = arith.mulf %4, %5 : vector<8x1xf32>
    %7 = vector.broadcast %6 : vector<8x1xf32> to vector<8x256xf32>
    %8 = arith.cmpf ogt, %0, %7 : vector<8x256xf32>
    %9 = arith.extui %8 : vector<8x256xi1> to vector<8x256xi32>
    %10 = arith.sitofp %9 : vector<8x256xi32> to vector<8x256xf32>
    %11 = arith.mulf %0, %10 : vector<8x256xf32>
    %c0_3 = arith.constant 0 : index
    %c0_4 = arith.constant 0 : index
    %12 = vector.load %arg2[%c0_3, %c0_4] : memref<8x256xf32, #tpu.memory_space<vmem>>, vector<8x256xf32>
    tpu.vector_store %arg2[%c0_3, %c0_4], %11 {strides = array<i32>} : memref<8x256xf32, #tpu.memory_space<vmem>>, vector<8x256xf32>,
    return
  }
  func.func @transform_0(%arg0: i32) -> (i32, i32) {
    %c0_i32 = arith.constant 0 : i32
    %c0_i32_0 = arith.constant 0 : i32
    return %arg0, %c0_i32 : i32, i32
  }
  func.func @transform_1(%arg0: i32) -> (i32, i32) {
    %c0_i32 = arith.constant 0 : i32
    %c0_i32_0 = arith.constant 0 : i32
    return %arg0, %c0_i32 : i32, i32
  }
}

</mosaic_0001>

<bundles_post_ra>
// kernel: adaptive_threshold_forward.1
= control target key start
LH: loop header
LB: loop body
LE: loop exit
PB: predicated region body
PF: predicated region fallthrough
CT: control target
= control target key end

     0   :  { %v31_v5 = vmov 0.0   ;;  %s54_s0 = inlined_call_operand.vmem [shape: f32[8,256], index: 0, kind: input, shape index: {}]   ;;  %s55_s1 = inlined_call_operand.vmem [shape: f32[8,256], index: 1, kind: output, shape index: {}]  }
   0x1   :  { %v8_v0 = vld [vmem:[%s54_s0] sm:$0xff]  ;;  %v9_v1 = vld [vmem:[%s54_s0 + $0x8] sm:$0xff] }
   0x2   :  { %v10_v2 = vadd.f32 %v9_v1, %v8_v0 }
   0x4   :  { %11 = vadd.xlane.f32.xlu0 %v10_v2 }
  0x77   :  { %v12_v3 = vpop.xlane.xlu0 %11 }
  0x78   :  { %v13_v4 = vmul.f32 0.00390625, %v12_v3 }
  0x7a   :  { %vm14_vm0 = vcmp.gt.f32.partialorder %v8_v0, %v13_v4  ;;  %vm15_vm1 = vcmp.gt.f32.partialorder %v9_v1, %v13_v4 }
  0x7b   :  { %v28_v6 = vsel %vm14_vm0, 1.0, %v31_v5  ;;  %v29_v7 = vsel %vm15_vm1, 1.0, %v31_v5 }
  0x7c   :  { %v20_v8 = vmul.f32 %v28_v6, %v8_v0  ;;  %v21_v9 = vmul.f32 %v29_v7, %v9_v1 }
  0x7e   :  { %22 = vst [vmem:[%s55_s1] sm:$0xff] %v20_v8 }
  0x7f   :  { %23 = vst [vmem:[%s55_s1 + $0x8] sm:$0xff] %v21_v9 }

</bundles_post_ra>
